<compile_context>
chip_gen: v7x
topology: tpu7x:2x2x1
jax: 0.10.0
libtpu: 0.0.40
codegen_flags: <defaults>
</compile_context>

<pallas_src>
import functools

import jax
import jax.numpy as jnp
from jax.experimental import pallas as pl
from jax.experimental.pallas import tpu as pltpu


def _round_up(v, m):
    return ((v + m - 1) // m) * m


# ----------------------------- Pallas kernel -------------------------------

def _classifier_kernel(x_ref, wf1_ref, bf1_ref, w2p_ref, b2p_ref, out_ref,
                       *, n_out, n_hid):
    """One fused tile: stage-1 fused GEMM -> ReLU -> stage-2 GEMM -> one store.

    wf1 columns: [0:n_out]        -> classifier head, already in final layout
                 [n_out:n_out+n_hid] -> discriminator hidden layer
    w2p columns: [0:n_out]        -> discriminator head in final layout
    """
    x = x_ref[...]                                            # (tm, K) in VMEM

    # Stage 1: single MXU weight push covering both the classifier head and
    # the discriminator hidden layer.
    s1 = (jnp.dot(x, wf1_ref[...], preferred_element_type=jnp.float32)
          + bf1_ref[...])                                     # (tm, n_out + n_hid)

    # Hidden activation stays in registers/VMEM; slice is 128-lane aligned.
    h = jnp.maximum(s1[:, n_out:n_out + n_hid], 0.0)

    # Stage 2 lands directly in the fused-output layout; single lane-dense
    # (multiple-of-128 wide) store for both heads.
    out_ref[...] = (
        s1[:, :n_out]
        + jnp.dot(h, w2p_ref[...], preferred_element_type=jnp.float32)
        + b2p_ref[...]
    )


def _pick_tm(m):
    """Batch tile: single sublane-aligned tile for small M, 128/256 for big M.

    (Never falls back to 8-row tiles for large batches: that left the MXU
    rows mostly empty and paid ~0.35us of per-grid-step overhead 65+ times.)
    """
    if m <= 256:
        return max(8, _round_up(m, 8))       # one tile
    if m <= 2048:
        return 128
    return 256


def classifier_forward(params, x, *, num_classes, num_ops):
    """x: (batch, in_features) f32 -> (class_logits, op_logits)."""
    m, k = x.shape
    wf1, bf1 = params["wf1"], params["bf1"]      # (K, Np+Nhp), (1, Np+Nhp)
    w2p, b2p = params["w2p"], params["b2p"]      # (Nhp, Np),   (1, Np)
    nf1 = wf1.shape[1]
    n_out = w2p.shape[1]                         # Np  (multiple of 128)
    n_hid = nf1 - n_out                          # Nhp (multiple of 128)

    # Pad batch to the chosen tile (tile-multiple only; sliced off once after
    # the single fused pallas_call, inside jit).
    tm = _pick_tm(m)
    m_pad = pl.cdiv(m, tm) * tm
    xp = x if m_pad == m else jnp.pad(x, ((0, m_pad - m), (0, 0)))

    # NOTE(scaling, v7x): for large in_features add pipeline_mode=pl.Buffered(1)
    # on the constant weight/bias specs, a K ("arbitrary", last) grid axis with
    # a VMEM accumulator, bf16 operands, and vmem_limit_bytes in CompilerParams.
    # All of these are no-ops / irrelevant at K=128, so they are left out here.
    fused = pl.pallas_call(
        functools.partial(_classifier_kernel, n_out=n_out, n_hid=n_hid),
        out_shape=jax.ShapeDtypeStruct((m_pad, n_out), jnp.float32),
        grid=(m_pad // tm,),
        in_specs=[
            pl.BlockSpec((tm, k), lambda i: (i, 0)),       # x tile
            pl.BlockSpec((k, nf1), lambda i: (0, 0)),      # fused [Wc|W1] (resident)
            pl.BlockSpec((1, nf1), lambda i: (0, 0)),      # fused [bc|b1]
            pl.BlockSpec((n_hid, n_out), lambda i: (0, 0)),  # W2 (padded layout)
            pl.BlockSpec((1, n_out), lambda i: (0, 0)),    # b2 (padded layout)
        ],
        out_specs=pl.BlockSpec((tm, n_out), lambda i: (i, 0)),
        compiler_params=pltpu.CompilerParams(
            dimension_semantics=("parallel",)),
    )(xp, wf1, bf1, w2p, b2p)

    cls = fused[:m, :num_classes]
    disc = fused[:m, num_classes:num_classes + num_ops]
    return cls, disc


classifier_forward_jit = jax.jit(
    classifier_forward, static_argnames=("num_classes", "num_ops"))


# --------------------------- parameter construction ------------------------

def _init_linear(key, fan_in, fan_out):
    """PyTorch nn.Linear default init, stored pre-transposed as (in, out)."""
    kw, kb = jax.random.split(key)
    bound = 1.0 / (fan_in ** 0.5)
    w = jax.random.uniform(kw, (fan_in, fan_out), jnp.float32, -bound, bound)
    b = jax.random.uniform(kb, (fan_out,), jnp.float32, -bound, bound)
    return w, b


def build_classifier_params(key, in_features, num_classes, num_ops):
    """Returns (kernel_params, raw_params).

    kernel_params hold the fused / zero-padded layouts consumed by the Pallas
    kernel; raw_params hold plain nn.Linear weights for reference checking.
    """
    kc, k1, k2 = jax.random.split(key, 3)
    wc, bc = _init_linear(kc, in_features, num_classes)    # classifier
    w1, b1 = _init_linear(k1, in_features, in_features)    # discriminator[0]
    w2, b2 = _init_linear(k2, in_features, num_ops)        # discriminator[2]

    k = in_features
    n_out = _round_up(num_classes + num_ops, 128)   # fused-logits width
    n_hid = _round_up(in_features, 128)             # padded hidden width

    # Stage-1 fused RHS: cols [0:n_out] = classifier head already in the final
    # output layout (cls at [0:Nc], zeros where disc will be added later);
    # cols [n_out:n_out+K] = hidden-layer weights.
    wf1 = jnp.zeros((k, n_out + n_hid), jnp.float32)
    wf1 = wf1.at[:, :num_classes].set(wc)
    wf1 = wf1.at[:, n_out:n_out + k].set(w1)
    bf1 = jnp.zeros((1, n_out + n_hid), jnp.float32)
    bf1 = bf1.at[0, :num_classes].set(bc)
    bf1 = bf1.at[0, n_out:n_out + k].set(b1)

    # Stage-2 RHS in the same fused-output coordinate system: disc logits land
    # at cols [Nc:Nc+No].  Padded hidden rows multiply zero weights.
    w2p = jnp.zeros((n_hid, n_out), jnp.float32)
    w2p = w2p.at[:k, num_classes:num_classes + num_ops].set(w2)
    b2p = jnp.zeros((1, n_out), jnp.float32)
    b2p = b2p.at[0, num_classes:num_classes + num_ops].set(b2)

    kernel_params = {"wf1": wf1, "bf1": bf1, "w2p": w2p, "b2p": b2p}
    raw_params = {"wc": wc, "bc": bc, "w1": w1, "b1": b1, "w2": w2, "b2": b2}
    return kernel_params, raw_params


# --------------------------------- main -------------------------------------

if __name__ == "__main__":
    key = jax.random.PRNGKey(0)
    pkey, xkey = jax.random.split(key)

    batch, in_features, num_classes, num_ops = 2, 128, 10, 16
    params, raw = build_classifier_params(pkey, in_features, num_classes, num_ops)
    x = jax.random.normal(xkey, (batch, in_features), jnp.float32)

    cls_logits, op_logits = classifier_forward_jit(
        params, x, num_classes=num_classes, num_ops=num_ops)
    cls_logits, op_logits = jax.block_until_ready((cls_logits, op_logits))

    assert cls_logits.shape == (batch, num_classes), cls_logits.shape
    assert op_logits.shape == (batch, num_ops), op_logits.shape

    # Pure-JAX reference check of the fused kernel against the un-fused layout.
    ref_cls = x @ raw["wc"] + raw["bc"]
    ref_h = jnp.maximum(x @ raw["w1"] + raw["b1"], 0.0)
    ref_disc = ref_h @ raw["w2"] + raw["b2"]
    assert jnp.allclose(cls_logits, ref_cls, atol=1e-4, rtol=1e-4)
    assert jnp.allclose(op_logits, ref_disc, atol=1e-4, rtol=1e-4)
    assert bool(jnp.all(jnp.isfinite(cls_logits)))
    assert bool(jnp.all(jnp.isfinite(op_logits)))

    print("KERNEL_OK")
</pallas_src>

<mosaic_0001>
module attributes {stable_mosaic.version = 11 : i64} {
  func.func @_classifier_kernel(%arg0: i32, %arg1: memref<8x128xf32, #tpu.memory_space<vmem>>, %arg2: memref<128x256xf32, #tpu.memory_space<vmem>>, %arg3: memref<1x256xf32, #tpu.memory_space<vmem>>, %arg4: memref<128x128xf32, #tpu.memory_space<vmem>>, %arg5: memref<1x128xf32, #tpu.memory_space<vmem>>, %arg6: memref<8x128xf32, #tpu.memory_space<vmem>>) attributes {dimension_semantics = [#tpu.dimension_semantics<parallel>], iteration_bounds = array<i64: 1>, scalar_prefetch = 0 : i64, scratch_operands = 0 : i64, tpu.core_type = #tpu.core_type<tc>, window_params = [{transform_indices = @transform_0, window_bounds = array<i64: 8, 128>}, {pipeline_mode = #tpu.pipeline_mode<synchronous>, transform_indices = @transform_1, window_bounds = array<i64: 128, 256>}, {pipeline_mode = #tpu.pipeline_mode<synchronous>, transform_indices = @transform_2, window_bounds = array<i64: 1, 256>}, {pipeline_mode = #tpu.pipeline_mode<synchronous>, transform_indices = @transform_3, window_bounds = array<i64: 128, 128>}, {pipeline_mode = #tpu.pipeline_mode<synchronous>, transform_indices = @transform_4, window_bounds = array<i64: 1, 128>}, {transform_indices = @transform_5, window_bounds = array<i64: 8, 128>}]} {
    %c0 = arith.constant 0 : index
    %c0_0 = arith.constant 0 : index
    %0 = vector.load %arg1[%c0, %c0_0] : memref<8x128xf32, #tpu.memory_space<vmem>>, vector<8x128xf32>
    %c0_1 = arith.constant 0 : index
    %c0_2 = arith.constant 0 : index
    %1 = vector.load %arg2[%c0_1, %c0_2] : memref<128x256xf32, #tpu.memory_space<vmem>>, vector<128x256xf32>
    %cst = arith.constant dense<0.000000e+00> : vector<8x256xf32>
    %2 = tpu.matmul %0, %1, %cst {dimension_numbers = #tpu.dot_dimension_numbers<[1], [0], [0], [1], [0, 0, 1, 1], [], []>} : vector<8x128xf32>, vector<128x256xf32>, vector<8x256xf32> -> vector<8x256xf32>
    %c0_3 = arith.constant 0 : index
    %c0_4 = arith.constant 0 : index
    %3 = vector.load %arg3[%c0_3, %c0_4] : memref<1x256xf32, #tpu.memory_space<vmem>>, vector<1x256xf32>
    %4 = vector.broadcast %3 : vector<1x256xf32> to vector<8x256xf32>
    %5 = arith.addf %2, %4 : vector<8x256xf32>
    %6 = vector.extract_strided_slice %5 {offsets = [0, 128], sizes = [8, 128], strides = [1, 1]} : vector<8x256xf32> to vector<8x128xf32>
    %cst_5 = arith.constant 0.000000e+00 : f32
    %7 = vector.broadcast %cst_5 : f32 to vector<8x128xf32>
    %8 = arith.maximumf %6, %7 : vector<8x128xf32>
    %9 = vector.extract_strided_slice %5 {offsets = [0, 0], sizes = [8, 128], strides = [1, 1]} : vector<8x256xf32> to vector<8x128xf32>
    %c0_6 = arith.constant 0 : index
    %c0_7 = arith.constant 0 : index
    %10 = vector.load %arg4[%c0_6, %c0_7] : memref<128x128xf32, #tpu.memory_space<vmem>>, vector<128x128xf32>
    %cst_8 = arith.constant dense<0.000000e+00> : vector<8x128xf32>
    %11 = tpu.matmul %8, %10, %cst_8 {dimension_numbers = #tpu.dot_dimension_numbers<[1], [0], [0], [1], [0, 0, 1, 1], [], []>} : vector<8x128xf32>, vector<128x128xf32>, vector<8x128xf32> -> vector<8x128xf32>
    %12 = arith.addf %9, %11 : vector<8x128xf32>
    %c0_9 = arith.constant 0 : index
    %c0_10 = arith.constant 0 : index
    %13 = vector.load %arg5[%c0_9, %c0_10] : memref<1x128xf32, #tpu.memory_space<vmem>>, vector<1x128xf32>
    %14 = vector.broadcast %13 : vector<1x128xf32> to vector<8x128xf32>
    %15 = arith.addf %12, %14 : vector<8x128xf32>
    %c0_11 = arith.constant 0 : index
    %c0_12 = arith.constant 0 : index
    %16 = vector.load %arg6[%c0_11, %c0_12] : memref<8x128xf32, #tpu.memory_space<vmem>>, vector<8x128xf32>
    tpu.vector_store %arg6[%c0_11, %c0_12], %15 {strides = array<i32>} : memref<8x128xf32, #tpu.memory_space<vmem>>, vector<8x128xf32>,
    return
  }
  func.func @transform_0(%arg0: i32) -> (i32, i32) {
    %c0_i32 = arith.constant 0 : i32
    %c0_i32_0 = arith.constant 0 : i32
    return %arg0, %c0_i32 : i32, i32
  }
  func.func @transform_1(%arg0: i32) -> (i32, i32) {
    %c0_i32 = arith.constant 0 : i32
    %c0_i32_0 = arith.constant 0 : i32
    %c0_i32_1 = arith.constant 0 : i32
    return %c0_i32, %c0_i32_0 : i32, i32
  }
  func.func @transform_2(%arg0: i32) -> (i32, i32) {
    %c0_i32 = arith.constant 0 : i32
    %c0_i32_0 = arith.constant 0 : i32
    %c0_i32_1 = arith.constant 0 : i32
    return %c0_i32, %c0_i32_0 : i32, i32
  }
  func.func @transform_3(%arg0: i32) -> (i32, i32) {
    %c0_i32 = arith.constant 0 : i32
    %c0_i32_0 = arith.constant 0 : i32
    %c0_i32_1 = arith.constant 0 : i32
    return %c0_i32, %c0_i32_0 : i32, i32
  }
  func.func @transform_4(%arg0: i32) -> (i32, i32) {
    %c0_i32 = arith.constant 0 : i32
    %c0_i32_0 = arith.constant 0 : i32
    %c0_i32_1 = arith.constant 0 : i32
    return %c0_i32, %c0_i32_0 : i32, i32
  }
  func.func @transform_5(%arg0: i32) -> (i32, i32) {
    %c0_i32 = arith.constant 0 : i32
    %c0_i32_0 = arith.constant 0 : i32
    return %arg0, %c0_i32 : i32, i32
  }
}

</mosaic_0001>

<bundles_post_ra>
// kernel: classifier_forward.1
= control target key start
LH: loop header
LB: loop body
LE: loop exit
PB: predicated region body
PF: predicated region fallthrough
CT: control target
= control target key end

     0   :  { %10 = vsyncpa [#allocation3], 0  ;;  %s518_s0 = inlined_call_operand.vmem [shape: f32[8,128], index: 0, kind: input, shape index: {}]   ;;  %s519_s1 = inlined_call_operand.hbm [shape: f32[128,256], index: 1, kind: input, shape index: {}]   ;;  %s520_s2 = inlined_call_operand.vmem [shape: f32[1,256], index: 2, kind: input, shape index: {}]   ;;  %s521_s3 = inlined_call_operand.hbm [shape: f32[128,128], index: 3, kind: input, shape index: {}]   ;;  %s522_s4 = inlined_call_operand.vmem [shape: f32[1,128], index: 4, kind: input, shape index: {}]   ;;  %s523_s5 = inlined_call_operand.vmem [shape: f32[8,128], index: 5, kind: output, shape index: {}]  }
   0x1   :  { %11 = vsyncpa [#allocation5], 0  ;;  %s433_s18 = smov [#allocation2]   ;;  %s385_s22 = scalar_lea.hbm %s519_s1, 4096 }
   0x2   :  { %s19_s19 = sshll.u32 %s433_s18, 4  ;;  %p386_p0 = scmp.ne.s32.totalorder %s519_s1, %s385_s22  ;;  %s20_s19 = int_to_ptr.vmem [resolvable:$true] %s19_s19 }
   0x3   :  { %p389_p1 = scmp.lt.u32.totalorder %s385_s22, %s519_s1 }
   0x5   :  { %p391_p2 = pnand %p389_p1, %p386_p0 }
   0x7   :  { %394 = shalt.err (!%p391_p2)
}
   0x8   :  { %s395_s27 = scalar_lea.vmem %s20_s19, 4096  ;;  %p400_p4 = scmp.lt.s32.totalorder %s20_s19, %s20_s19 }
   0x9   :  { %p396_p3 = scmp.ne.s32.totalorder %s20_s19, %s395_s27  ;;  %p401_p5 = scmp.lt.s32.totalorder %s395_s27, %s395_s27 }
   0xb   :  { %p402_p6 = por %p401_p5, %p400_p4 }
   0xd   :  { %p403_p7 = pnand %p402_p6, %p396_p3 }
   0xf   :  { %406 = shalt.err (!%p403_p7)
}
  0x10   :  { %s434_s28 = smov 256   ;;  %s435_s29 = smov 16  }
  0x11   :  { %25 = dma.hbm_to_vmem [thread:$0]  %s519_s1, 4096, %s20_s19, [#allocation3], %s434_s28, %s434_s28, %s435_s29  }
  0x12   :  { %s436_s7 = smov [#allocation4]   ;;  %s407_s11 = scalar_lea.hbm %s521_s3, 2048 }
  0x13   :  { %s33_s8 = sshll.u32 %s436_s7, 4  ;;  %p408_p8 = scmp.ne.s32.totalorder %s521_s3, %s407_s11  ;;  %s34_s8 = int_to_ptr.vmem [resolvable:$true] %s33_s8 }
  0x14   :  { %p411_p9 = scmp.lt.u32.totalorder %s407_s11, %s521_s3 }
  0x16   :  { %p413_p10 = pnand %p411_p9, %p408_p8 }
  0x18   :  { %416 = shalt.err (!%p413_p10)
}
  0x19   :  { %s417_s16 = scalar_lea.vmem %s34_s8, 2048  ;;  %p422_p12 = scmp.lt.s32.totalorder %s34_s8, %s34_s8 }
  0x1a   :  { %p418_p11 = scmp.ne.s32.totalorder %s34_s8, %s417_s16  ;;  %p423_p13 = scmp.lt.s32.totalorder %s417_s16, %s417_s16 }
  0x1c   :  { %p424_p0 = por %p423_p13, %p422_p12 }
  0x1e   :  { %p425_p1 = pnand %p424_p0, %p418_p11 }
  0x20   :  { %428 = shalt.err (!%p425_p1)
}
  0x21   :  { %s437_s1 = smov 128   ;;  %s438_s17 = smov 8  }
  0x22   :  { %39 = dma.hbm_to_vmem [thread:$0]  %s521_s3, 2048, %s34_s8, [#allocation5], %s437_s1, %s437_s1, %s438_s17  }
  0x23   :  { %429 = dma.done.wait [#allocation3], 4096  }
  0x24   :  { %430 = vsyncadd [#allocation3], 4294963200 }
  0x25   :  { %431 = dma.done.wait [#allocation5], 2048  }
  0x26   :  { %432 = vsyncadd [#allocation5], 4294965248  ;;  %v439_v0 = vmov 0.0   ;;  %v440_v1 = vmov 0.0|0.0   ;;  %v50_v2 = vld [vmem:[#allocation2 + $0x8] sm:$0xff]  ;;  %v52_v3 = vld [vmem:[#allocation2 + $0x18] sm:$0xff] }
  0x27   :  { %157 = vmatprep.mubr.f32.mxu0 %v439_v0  ;;  %352 = vmatprep.subr.bf16.mxu1 %v440_v1  ;;  %v49_v4 = vld [vmem:[#allocation2] sm:$0xff]  ;;  %v320_v5 = vpack.c.bf16 %v52_v3, %v50_v2  ;;  %v51_v6 = vld [vmem:[#allocation2 + $0x10] sm:$0xff]  ;;  %v54_v7 = vld [vmem:[#allocation2 + $0x28] sm:$0xff]  ;;  %vm441_vm0 = vmmov 0  }
  0x28   :  { %v56_v8 = vld [vmem:[#allocation2 + $0x38] sm:$0xff]  ;;  %v322_v9 = vpack.c.bf16 %v51_v6, %v49_v4  ;;  %v53_v11 = vld [vmem:[#allocation2 + $0x20] sm:$0xff]  ;;  %v55_v12 = vld [vmem:[#allocation2 + $0x30] sm:$0xff]  ;;  %317 = vmatprep.mubr.msk.f32.mxu1 %vm441_vm0, %v439_v0 }
  0x29   :  { %v324_v10 = vpack.c.bf16 %v56_v8, %v54_v7  ;;  %v58_v13 = vld [vmem:[#allocation2 + $0x48] sm:$0xff]  ;;  %321 = vmatprep.subr.bf16.mxu0 %v320_v5  ;;  %v60_v14 = vld [vmem:[#allocation2 + $0x58] sm:$0xff]  ;;  %v326_v15 = vpack.c.bf16 %v55_v12, %v53_v11  ;;  %v57_v17 = vld [vmem:[#allocation2 + $0x40] sm:$0xff] }
  0x2a   :  { %323 = vmatpush1.bf16.msra.mxu0 %v322_v9  ;;  %v328_v16 = vpack.c.bf16 %v60_v14, %v58_v13  ;;  %v59_v18 = vld [vmem:[#allocation2 + $0x50] sm:$0xff]  ;;  %v62_v19 = vld [vmem:[#allocation2 + $0x68] sm:$0xff]  ;;  %v64_v20 = vld [vmem:[#allocation2 + $0x78] sm:$0xff]  ;;  %v83_v13 = vlaneseq }
  0x2b   :  { %325 = vmatprep.subr.bf16.mxu0 %v324_v10  ;;  %v330_v21 = vpack.c.bf16 %v59_v18, %v57_v17  ;;  %v332_v22 = vpack.c.bf16 %v64_v20, %v62_v19  ;;  %v61_v23 = vld [vmem:[#allocation2 + $0x60] sm:$0xff]  ;;  %v63_v24 = vld [vmem:[#allocation2 + $0x70] sm:$0xff]  ;;  %v66_v25 = vld [vmem:[#allocation2 + $0x88] sm:$0xff] }
  0x2c   :  { %v68_v26 = vld [vmem:[#allocation2 + $0x98] sm:$0xff]  ;;  %v165_v27 = vld [vmem:[#allocation4] sm:$0xff]  ;;  %v166_v28 = vld [vmem:[#allocation4 + $0x8] sm:$0xff]  ;;  %v334_v30 = vpack.c.bf16 %v63_v24, %v61_v23  ;;  %v84_v14 = vshrl.u32 %v83_v13, 7 }
  0x2d   :  { %v167_v29 = vld [vmem:[#allocation4 + $0x10] sm:$0xff]  ;;  %v353_v31 = vpack.c.bf16 %v166_v28, %v165_v27  ;;  %v168_v32 = vld [vmem:[#allocation4 + $0x18] sm:$0xff]  ;;  %v336_v33 = vpack.c.bf16 %v68_v26, %v66_v25  ;;  %v65_v34 = vld [vmem:[#allocation2 + $0x80] sm:$0xff] }
  0x2e   :  { %327 = vmatpush1.bf16.msra.mxu0 %v326_v15  ;;  %v67_v35 = vld [vmem:[#allocation2 + $0x90] sm:$0xff]  ;;  %v70_v36 = vld [vmem:[#allocation2 + $0xa8] sm:$0xff]  ;;  %v72_v37 = vld [vmem:[#allocation2 + $0xb8] sm:$0xff]  ;;  %v356_v38 = vpack.c.bf16 %v168_v32, %v167_v29  ;;  %v89_v15 = vsub.s32 1, %v84_v14 }
  0x2f   :  { %329 = vmatprep.subr.bf16.mxu0 %v328_v16  ;;  %354 = vmatpush3.bf16.msra.mxu1 %v353_v31  ;;  %v169_v39 = vld [vmem:[#allocation4 + $0x20] sm:$0xff]  ;;  %v170_v40 = vld [vmem:[#allocation4 + $0x28] sm:$0xff]  ;;  %v338_v41 = vpack.c.bf16 %v67_v35, %v65_v34  ;;  %v340_v42 = vpack.c.bf16 %v72_v37, %v70_v36  ;;  %v71_v44 = vld [vmem:[#allocation2 + $0xb0] sm:$0xff] }
  0x30   :  { %355 = vmatprep.subr.bf16.mxu1 %v440_v1  ;;  %v69_v43 = vld [vmem:[#allocation2 + $0xa0] sm:$0xff]  ;;  %v74_v45 = vld [vmem:[#allocation2 + $0xc8] sm:$0xff]  ;;  %v76_v46 = vld [vmem:[#allocation2 + $0xd8] sm:$0xff]  ;;  %v359_v47 = vpack.c.bf16 %v170_v40, %v169_v39 }
  0x31   :  { %v171_v48 = vld [vmem:[#allocation4 + $0x30] sm:$0xff]  ;;  %v172_v49 = vld [vmem:[#allocation4 + $0x38] sm:$0xff]  ;;  %v342_v50 = vpack.c.bf16 %v71_v44, %v69_v43  ;;  %v344_v51 = vpack.c.bf16 %v76_v46, %v74_v45  ;;  %v73_v52 = vld [vmem:[#allocation2 + $0xc0] sm:$0xff] }
  0x32   :  { %331 = vmatpush1.bf16.msra.mxu0 %v330_v21  ;;  %v75_v53 = vld [vmem:[#allocation2 + $0xd0] sm:$0xff]  ;;  %v78_v54 = vld [vmem:[#allocation2 + $0xe8] sm:$0xff]  ;;  %v80_v55 = vld [vmem:[#allocation2 + $0xf8] sm:$0xff]  ;;  %v362_v56 = vpack.c.bf16 %v172_v49, %v171_v48 }
  0x33   :  { %333 = vmatprep.subr.bf16.mxu0 %v332_v22  ;;  %357 = vmatpush3.bf16.msra.mxu1 %v356_v38  ;;  %v173_v57 = vld [vmem:[#allocation4 + $0x40] sm:$0xff]  ;;  %v174_v58 = vld [vmem:[#allocation4 + $0x48] sm:$0xff]  ;;  %v346_v59 = vpack.c.bf16 %v75_v53, %v73_v52  ;;  %v348_v60 = vpack.c.bf16 %v80_v55, %v78_v54  ;;  %v79_v62 = vld [vmem:[#allocation2 + $0xf0] sm:$0xff] }
  0x34   :  { %358 = vmatprep.subr.bf16.mxu1 %v440_v1  ;;  %v77_v61 = vld [vmem:[#allocation2 + $0xe0] sm:$0xff]  ;;  %v365_v63 = vpack.c.bf16 %v174_v58, %v173_v57  ;;  %v175_v2 = vld [vmem:[#allocation4 + $0x50] sm:$0xff]  ;;  %v176_v3 = vld [vmem:[#allocation4 + $0x58] sm:$0xff] }
  0x35   :  { %v350_v4 = vpack.c.bf16 %v79_v62, %v77_v61  ;;  %v368_v5 = vpack.c.bf16 %v176_v3, %v175_v2  ;;  %v177_v6 = vld [vmem:[#allocation4 + $0x60] sm:$0xff]  ;;  %v178_v7 = vld [vmem:[#allocation4 + $0x68] sm:$0xff]  ;;  %v179_v10 = vld [vmem:[#allocation4 + $0x70] sm:$0xff] }
  0x36   :  { %335 = vmatpush1.bf16.msra.mxu0 %v334_v30  ;;  %v48_v8 = vld [vmem:[%s518_s0] sm:$0xff]  ;;  %v371_v9 = vpack.c.bf16 %v178_v7, %v177_v6  ;;  %v180_v11 = vld [vmem:[#allocation4 + $0x78] sm:$0xff] }
  0x37   :  { %337 = vmatprep.subr.bf16.mxu0 %v336_v33  ;;  %360 = vmatpush3.bf16.msra.mxu1 %v359_v47  ;;  %v374_v12 = vpack.c.bf16 %v180_v11, %v179_v10  ;;  %v81_v16 = vld [vmem:[%s520_s2] sm:$0x3] }
  0x38   :  { %361 = vmatprep.subr.bf16.mxu1 %v440_v1  ;;  %v90_v17 = vrot.slane %v81_v16, %v89_v15  ;;  %v267_v0 = vld [vmem:[%s522_s4] ss:$0 sm:$0xff] }
  0x3a   :  { %339 = vmatpush1.bf16.msra.mxu0 %v338_v41 }
  0x3b   :  { %341 = vmatprep.subr.bf16.mxu0 %v340_v42  ;;  %363 = vmatpush3.bf16.msra.mxu1 %v362_v56 }
  0x3c   :  { %364 = vmatprep.subr.bf16.mxu1 %v440_v1 }
  0x3e   :  { %343 = vmatpush1.bf16.msra.mxu0 %v342_v50 }
  0x3f   :  { %345 = vmatprep.subr.bf16.mxu0 %v344_v51  ;;  %366 = vmatpush3.bf16.msra.mxu1 %v365_v63 }
  0x40   :  { %367 = vmatprep.subr.bf16.mxu1 %v440_v1 }
  0x42   :  { %347 = vmatpush1.bf16.msra.mxu0 %v346_v59 }
  0x43   :  { %349 = vmatprep.subr.bf16.mxu0 %v348_v60  ;;  %369 = vmatpush3.bf16.msra.mxu1 %v368_v5 }
  0x44   :  { %370 = vmatprep.subr.bf16.mxu1 %v440_v1 }
  0x46   :  { %351 = vmatpush1.bf16.msra.mxu0 %v350_v4 }
  0x47   :  { %372 = vmatpush3.bf16.msra.mxu1 %v371_v9 }
  0x48   :  { %373 = vmatprep.subr.bf16.mxu1 %v440_v1  ;;  %v85_v1 = vsub.s32 0, %v84_v14 }
  0x49   :  { %158 = vmatmul.mubr.f32.vlgmr.msra.gmra.mrb[0].mxu0 %v48_v8 }
  0x4a   :  { %v86_v22 = vrot.slane %v81_v16, %v85_v1 }
  0x4b   :  { %375 = vmatpush3.bf16.msra.mxu1 %v374_v12 }
 0x11c   :  { %v159_v18 = vpop.f32.mrb[0].mxu0 }
 0x11d   :  { %v161_v19 = vpop.f32.mrb[1].mxu0  ;;  %v160_v23 = vadd.f32 %v159_v18, %v86_v22 }
 0x11e   :  { %v162_v20 = vadd.f32 %v161_v19, %v90_v17 }
 0x120   :  { %v164_v21 = vmax.f32 %v162_v20, 0.0 }
 0x122   :  { %318 = vmatmul.mubr.f32.vlgmr.msra.gmra.mrb[0].mxu1 %v164_v21 }
 0x1f5   :  { %v247_v24 = vpop.f32.mrb[0].mxu1 }
 0x1f6   :  { %v251_v25 = vadd.f32 %v247_v24, %v160_v23  ;;  %v319_v26 = vpop.f32.mrb[1].mxu1 }
 0x1f8   :  { %v259_v27 = vadd.f32 %v267_v0, %v251_v25 }
 0x1fa   :  { %260 = vst [vmem:[%s523_s5] sm:$0xff] %v259_v27 }
 0x1fb   :  { %265 = vsyncpa [#allocation3], 1 }
 0x1fc   :  { %266 = vsyncpa [#allocation5], 1 }

</bundles_post_ra>
